<compile_context>
chip_gen: v7x
topology: tpu7x:2x2x1
jax: 0.10.0
libtpu: 0.0.40
codegen_flags: <defaults>
</compile_context>

<pallas_src>
import jax
import jax.numpy as jnp
from jax.experimental import pallas as pl
from jax.experimental.pallas import tpu as pltpu

NUM_ITEMS = 2079
NUM_USERS = 50
HIDDEN_LAYERS = [16, 8, 8, 8]
GMF_EMB = 8
MLP_EMB = 8

# Lane offsets inside the packed (8, 128) weight slab.
_W1, _W2, _W3 = 0, 16, 24          # w1: [:,0:16], w2: [:,16:24], w3: [:,24:32]
_B1, _B2, _B3 = 32, 33, 34         # biases: one lane each, all 8 sublanes
_WOM, _WOG, _BO = 48, 56, 64       # output layer lives on sublane 0


def neucf_kernel(emb_ref, w_ref, out_ref):
    # emb_ref: (32, TB) feature-major slab = [mlp_u; mlp_i; gmf_u; gmf_i] rows,
    #          TB batch columns on the lane axis (MXU "N" dimension).
    # w_ref:   (8, 128) packed weights/biases, resident across all grid steps.
    emb = emb_ref[...]
    W = w_ref[...]

    w1 = W[:, _W1:_W1 + 16]            # (8, 16)  fc1 (user||item already contiguous)
    w2 = W[:, _W2:_W2 + 8]             # (8, 8)
    w3 = W[:, _W3:_W3 + 8]             # (8, 8)
    b1 = W[:, _B1:_B1 + 1]             # (8, 1)
    b2 = W[:, _B2:_B2 + 1]
    b3 = W[:, _B3:_B3 + 1]
    wo_m = W[0:1, _WOM:_WOM + 8]       # (1, 8) output-layer mlp half
    wo_g = W[0:1, _WOG:_WOG + 8]       # (1, 8) output-layer gmf half
    bo = W[0:1, _BO:_BO + 1]           # (1, 1)

    # MLP tower (feature-major: h = W @ x), single merged fc1 matmul.
    h = jnp.dot(w1, emb[0:16, :], preferred_element_type=jnp.float32) + b1   # (8, TB)
    h = jnp.maximum(h, 0.0)
    h = jnp.maximum(jnp.dot(w2, h, preferred_element_type=jnp.float32) + b2, 0.0)
    h = jnp.maximum(jnp.dot(w3, h, preferred_element_type=jnp.float32) + b3, 0.0)

    # GMF tower: pure VPU elementwise product, full 128-lane utilisation.
    g = emb[16:24, :] * emb[24:32, :]                                        # (8, TB)

    # Output layer with pre-split weight halves (no in-kernel concat), then sigmoid.
    logits = (jnp.dot(wo_m, h, preferred_element_type=jnp.float32)
              + jnp.dot(wo_g, g, preferred_element_type=jnp.float32)
              + bo)                                                          # (1, TB)
    out_ref[...] = jax.nn.sigmoid(logits)                                    # lane-dense store


def _pack_weights(params):
    """Pack all fc weights/biases into one (8, 128) f32 slab (single resident DMA)."""
    w = jnp.zeros((8, 128), jnp.float32)
    w = w.at[:, _W1:_W1 + 16].set(params["w1"])
    w = w.at[:, _W2:_W2 + 8].set(params["w2"])
    w = w.at[:, _W3:_W3 + 8].set(params["w3"])
    w = w.at[:, _B1].set(params["b1"])
    w = w.at[:, _B2].set(params["b2"])
    w = w.at[:, _B3].set(params["b3"])
    w = w.at[0, _WOM:_WOM + 8].set(params["wo"][0, 0:MLP_EMB])
    w = w.at[0, _WOG:_WOG + 8].set(params["wo"][0, MLP_EMB:MLP_EMB + GMF_EMB])
    w = w.at[0, _BO].set(params["bo"][0])
    return w


def neucf_forward(params, user_indices, item_indices, *, tile_b=2048):
    """Returns (B, 1) predictions, matching the PyTorch module's forward."""
    B = user_indices.shape[0]

    # Batch tiling: granularity 512 lanes; small batches get a single small tile,
    # large batches use tile_b (>=2048) so per-step overhead is amortised.
    # v7x note: at serving batch sizes this yields >= 2 grid steps, so
    # dimension_semantics=("parallel",) keeps both TensorCores busy.
    tile = min(tile_b, pl.cdiv(B, 512) * 512)
    b_pad = pl.cdiv(B, tile) * tile
    grid = (b_pad // tile,)

    # Pad the *indices* (cheap int32) instead of the gathered slab (no extra HBM pass).
    u_idx = user_indices.astype(jnp.int32)
    i_idx = item_indices.astype(jnp.int32)
    if b_pad != B:
        u_idx = jnp.pad(u_idx, (0, b_pad - B))
        i_idx = jnp.pad(i_idx, (0, b_pad - B))

    # Feature-major gather straight from transposed tables: the (32, b_pad) slab is
    # produced in its final layout, no host-side transpose of a batch-sized array.
    # (Table transposes are tiny: 50x16 and 2079x16 elements.)
    uT = jnp.concatenate([params["mlp_user_emb"], params["gmf_user_emb"]], axis=1).T  # (16, 50)
    iT = jnp.concatenate([params["mlp_item_emb"], params["gmf_item_emb"]], axis=1).T  # (16, 2079)
    ug = uT[:, u_idx]                                   # (16, b_pad): [mlp_u; gmf_u]
    ig = iT[:, i_idx]                                   # (16, b_pad): [mlp_i; gmf_i]
    slab = jnp.concatenate([ug[0:8], ig[0:8], ug[8:16], ig[8:16]], axis=0)  # (32, b_pad)

    wslab = _pack_weights(params)                       # (8, 128)

    # Memory-bound cost hint: ~132 B and ~600 flops + 1 exp per batch element.
    cost = pl.CostEstimate(
        flops=600 * b_pad,
        transcendentals=b_pad,
        bytes_accessed=(4 * MLP_EMB + 1) * 4 * b_pad + 8 * 128 * 4,
    )

    out = pl.pallas_call(
        neucf_kernel,
        out_shape=jax.ShapeDtypeStruct((1, b_pad), jnp.float32),
        grid=grid,
        in_specs=[
            pl.BlockSpec((4 * MLP_EMB, tile), lambda i: (0, i)),   # activation slab
            pl.BlockSpec((8, 128), lambda i: (0, 0)),              # packed weights (resident)
        ],
        out_specs=pl.BlockSpec((1, tile), lambda i: (0, i)),       # lane-dense output
        compiler_params=pltpu.CompilerParams(
            dimension_semantics=("parallel",),     # shards grid steps across v7x TCs
            vmem_limit_bytes=32 * 1024 * 1024,     # plenty even at tile_b=8192; safe on v7x
        ),
        cost_estimate=cost,
    )(slab, wslab)

    return out[0, :B][:, None]                                     # (B, 1)


def init_params(key):
    """Deterministic synthetic parameters matching the PyTorch module's shapes.

    Embedding tables are (num_rows, emb); fc weights are (out, in) and biases (out,)
    exactly like nn.Linear / nn.Embedding. Packing/splitting for the kernel happens
    in the wrapper.
    """
    ks = jax.random.split(key, 12)
    s = 0.1
    return {
        "mlp_user_emb": s * jax.random.normal(ks[0], (NUM_USERS, MLP_EMB), jnp.float32),
        "mlp_item_emb": s * jax.random.normal(ks[1], (NUM_ITEMS, MLP_EMB), jnp.float32),
        "gmf_user_emb": s * jax.random.normal(ks[2], (NUM_USERS, GMF_EMB), jnp.float32),
        "gmf_item_emb": s * jax.random.normal(ks[3], (NUM_ITEMS, GMF_EMB), jnp.float32),
        # MLP fc layers: Linear(16->8), Linear(8->8), Linear(8->8)
        "w1": s * jax.random.normal(ks[4], (HIDDEN_LAYERS[1], HIDDEN_LAYERS[0]), jnp.float32),
        "b1": s * jax.random.normal(ks[5], (HIDDEN_LAYERS[1],), jnp.float32),
        "w2": s * jax.random.normal(ks[6], (HIDDEN_LAYERS[2], HIDDEN_LAYERS[1]), jnp.float32),
        "b2": s * jax.random.normal(ks[7], (HIDDEN_LAYERS[2],), jnp.float32),
        "w3": s * jax.random.normal(ks[8], (HIDDEN_LAYERS[3], HIDDEN_LAYERS[2]), jnp.float32),
        "b3": s * jax.random.normal(ks[9], (HIDDEN_LAYERS[3],), jnp.float32),
        # Output layer: Linear(hidden[-1] + gmf_emb -> 1)
        "wo": s * jax.random.normal(ks[10], (1, HIDDEN_LAYERS[-1] + GMF_EMB), jnp.float32),
        "bo": s * jax.random.normal(ks[11], (1,), jnp.float32),
    }


def neucf_reference(params, user_indices, item_indices):
    """Pure-JAX reference mirroring the PyTorch forward (batch-major), for verification."""
    mlp_u = params["mlp_user_emb"][user_indices]
    mlp_i = params["mlp_item_emb"][item_indices]
    gmf_u = params["gmf_user_emb"][user_indices]
    gmf_i = params["gmf_item_emb"][item_indices]

    x = jnp.concatenate([mlp_u, mlp_i], axis=-1)                     # (B, 16)
    x = jax.nn.relu(x @ params["w1"].T + params["b1"])
    x = jax.nn.relu(x @ params["w2"].T + params["b2"])
    x = jax.nn.relu(x @ params["w3"].T + params["b3"])

    g = gmf_u * gmf_i                                                # (B, 8)

    c = jnp.concatenate([x, g], axis=-1)                             # (B, 16)
    return jax.nn.sigmoid(c @ params["wo"].T + params["bo"])         # (B, 1)


if __name__ == "__main__":
    key = jax.random.PRNGKey(0)
    k_users, k_items, k_params = jax.random.split(key, 3)

    B = 8  # small demo batch; kernel pads lanes internally to one 512-wide tile
    user_indices = jax.random.randint(k_users, (B,), 0, NUM_USERS, dtype=jnp.int32)
    item_indices = jax.random.randint(k_items, (B,), 0, NUM_ITEMS, dtype=jnp.int32)

    params = init_params(k_params)

    fwd = jax.jit(neucf_forward)
    out = jax.block_until_ready(fwd(params, user_indices, item_indices))

    ref = neucf_reference(params, user_indices, item_indices)
    assert out.shape == (B, 1), out.shape
    assert jnp.allclose(out, ref, atol=1e-5, rtol=1e-5), (out, ref)

    print("KERNEL_OK")
</pallas_src>

<mosaic_0001>
module attributes {stable_mosaic.version = 11 : i64} {
  func.func @neucf_kernel(%arg0: i32, %arg1: memref<32x512xf32, #tpu.memory_space<vmem>>, %arg2: memref<8x128xf32, #tpu.memory_space<vmem>>, %arg3: memref<1x512xf32, #tpu.memory_space<vmem>>) attributes {dimension_semantics = [#tpu.dimension_semantics<parallel>], iteration_bounds = array<i64: 1>, scalar_prefetch = 0 : i64, scratch_operands = 0 : i64, tpu.core_type = #tpu.core_type<tc>, window_params = [{transform_indices = @transform_0, window_bounds = array<i64: 32, 512>}, {pipeline_mode = #tpu.pipeline_mode<synchronous>, transform_indices = @transform_1, window_bounds = array<i64: 8, 128>}, {transform_indices = @transform_2, window_bounds = array<i64: 1, 512>}]} {
    %c0 = arith.constant 0 : index
    %c0_0 = arith.constant 0 : index
    %0 = vector.load %arg1[%c0, %c0_0] : memref<32x512xf32, #tpu.memory_space<vmem>>, vector<32x512xf32>
    %c0_1 = arith.constant 0 : index
    %c0_2 = arith.constant 0 : index
    %1 = vector.load %arg2[%c0_1, %c0_2] : memref<8x128xf32, #tpu.memory_space<vmem>>, vector<8x128xf32>
    %2 = vector.extract_strided_slice %1 {offsets = [0, 0], sizes = [8, 16], strides = [1, 1]} : vector<8x128xf32> to vector<8x16xf32>
    %3 = vector.extract_strided_slice %1 {offsets = [0, 16], sizes = [8, 8], strides = [1, 1]} : vector<8x128xf32> to vector<8x8xf32>
    %4 = vector.extract_strided_slice %1 {offsets = [0, 24], sizes = [8, 8], strides = [1, 1]} : vector<8x128xf32> to vector<8x8xf32>
    %5 = vector.extract_strided_slice %1 {offsets = [0, 32], sizes = [8, 1], strides = [1, 1]} : vector<8x128xf32> to vector<8x1xf32>
    %6 = vector.extract_strided_slice %1 {offsets = [0, 33], sizes = [8, 1], strides = [1, 1]} : vector<8x128xf32> to vector<8x1xf32>
    %7 = vector.extract_strided_slice %1 {offsets = [0, 34], sizes = [8, 1], strides = [1, 1]} : vector<8x128xf32> to vector<8x1xf32>
    %8 = vector.extract_strided_slice %1 {offsets = [0, 48], sizes = [1, 8], strides = [1, 1]} : vector<8x128xf32> to vector<1x8xf32>
    %9 = vector.extract_strided_slice %1 {offsets = [0, 56], sizes = [1, 8], strides = [1, 1]} : vector<8x128xf32> to vector<1x8xf32>
    %10 = vector.extract_strided_slice %1 {offsets = [0, 64], sizes = [1, 1], strides = [1, 1]} : vector<8x128xf32> to vector<1x1xf32>
    %11 = vector.extract_strided_slice %0 {offsets = [0, 0], sizes = [16, 512], strides = [1, 1]} : vector<32x512xf32> to vector<16x512xf32>
    %cst = arith.constant dense<0.000000e+00> : vector<8x512xf32>
    %12 = tpu.matmul %2, %11, %cst {dimension_numbers = #tpu.dot_dimension_numbers<[1], [0], [0], [1], [0, 0, 1, 1], [], []>} : vector<8x16xf32>, vector<16x512xf32>, vector<8x512xf32> -> vector<8x512xf32>
    %13 = vector.broadcast %5 : vector<8x1xf32> to vector<8x512xf32>
    %14 = arith.addf %12, %13 : vector<8x512xf32>
    %cst_3 = arith.constant 0.000000e+00 : f32
    %15 = vector.broadcast %cst_3 : f32 to vector<8x512xf32>
    %16 = arith.maximumf %14, %15 : vector<8x512xf32>
    %cst_4 = arith.constant dense<0.000000e+00> : vector<8x512xf32>
    %17 = tpu.matmul %3, %16, %cst_4 {dimension_numbers = #tpu.dot_dimension_numbers<[1], [0], [0], [1], [0, 0, 1, 1], [], []>} : vector<8x8xf32>, vector<8x512xf32>, vector<8x512xf32> -> vector<8x512xf32>
    %18 = vector.broadcast %6 : vector<8x1xf32> to vector<8x512xf32>
    %19 = arith.addf %17, %18 : vector<8x512xf32>
    %cst_5 = arith.constant 0.000000e+00 : f32
    %20 = vector.broadcast %cst_5 : f32 to vector<8x512xf32>
    %21 = arith.maximumf %19, %20 : vector<8x512xf32>
    %cst_6 = arith.constant dense<0.000000e+00> : vector<8x512xf32>
    %22 = tpu.matmul %4, %21, %cst_6 {dimension_numbers = #tpu.dot_dimension_numbers<[1], [0], [0], [1], [0, 0, 1, 1], [], []>} : vector<8x8xf32>, vector<8x512xf32>, vector<8x512xf32> -> vector<8x512xf32>
    %23 = vector.broadcast %7 : vector<8x1xf32> to vector<8x512xf32>
    %24 = arith.addf %22, %23 : vector<8x512xf32>
    %cst_7 = arith.constant 0.000000e+00 : f32
    %25 = vector.broadcast %cst_7 : f32 to vector<8x512xf32>
    %26 = arith.maximumf %24, %25 : vector<8x512xf32>
    %27 = vector.extract_strided_slice %0 {offsets = [16, 0], sizes = [8, 512], strides = [1, 1]} : vector<32x512xf32> to vector<8x512xf32>
    %28 = vector.extract_strided_slice %0 {offsets = [24, 0], sizes = [8, 512], strides = [1, 1]} : vector<32x512xf32> to vector<8x512xf32>
    %29 = arith.mulf %27, %28 : vector<8x512xf32>
    %cst_8 = arith.constant dense<0.000000e+00> : vector<1x512xf32>
    %30 = tpu.matmul %8, %26, %cst_8 {dimension_numbers = #tpu.dot_dimension_numbers<[1], [0], [0], [1], [0, 0, 1, 1], [], []>} : vector<1x8xf32>, vector<8x512xf32>, vector<1x512xf32> -> vector<1x512xf32>
    %cst_9 = arith.constant dense<0.000000e+00> : vector<1x512xf32>
    %31 = tpu.matmul %9, %29, %cst_9 {dimension_numbers = #tpu.dot_dimension_numbers<[1], [0], [0], [1], [0, 0, 1, 1], [], []>} : vector<1x8xf32>, vector<8x512xf32>, vector<1x512xf32> -> vector<1x512xf32>
    %32 = arith.addf %30, %31 : vector<1x512xf32>
    %33 = vector.broadcast %10 : vector<1x1xf32> to vector<1x512xf32>
    %34 = arith.addf %32, %33 : vector<1x512xf32>
    %35 = arith.negf %34 : vector<1x512xf32>
    %36 = math.exp %35 : vector<1x512xf32>
    %cst_10 = arith.constant 1.000000e+00 : f32
    %37 = vector.broadcast %cst_10 : f32 to vector<1x512xf32>
    %38 = arith.addf %37, %36 : vector<1x512xf32>
    %39 = arith.divf %37, %38 : vector<1x512xf32>
    %c0_11 = arith.constant 0 : index
    %c0_12 = arith.constant 0 : index
    %40 = vector.load %arg3[%c0_11, %c0_12] : memref<1x512xf32, #tpu.memory_space<vmem>>, vector<1x512xf32>
    tpu.vector_store %arg3[%c0_11, %c0_12], %39 {strides = array<i32>} : memref<1x512xf32, #tpu.memory_space<vmem>>, vector<1x512xf32>,
    return
  }
  func.func @transform_0(%arg0: i32) -> (i32, i32) {
    %c0_i32 = arith.constant 0 : i32
    %c0_i32_0 = arith.constant 0 : i32
    return %c0_i32, %arg0 : i32, i32
  }
  func.func @transform_1(%arg0: i32) -> (i32, i32) {
    %c0_i32 = arith.constant 0 : i32
    %c0_i32_0 = arith.constant 0 : i32
    %c0_i32_1 = arith.constant 0 : i32
    return %c0_i32, %c0_i32_0 : i32, i32
  }
  func.func @transform_2(%arg0: i32) -> (i32, i32) {
    %c0_i32 = arith.constant 0 : i32
    %c0_i32_0 = arith.constant 0 : i32
    return %c0_i32, %arg0 : i32, i32
  }
}

</mosaic_0001>

<bundles_post_ra>
// kernel: neucf_forward.1
= control target key start
LH: loop header
LB: loop body
LE: loop exit
PB: predicated region body
PF: predicated region fallthrough
CT: control target
= control target key end

     0   :  { %v913_v3 = vmov 0.0   ;;  %v914_v8 = vmov 32   ;;  %vm33_vm0 = vcmask 130048   ;;  %s915_s27 = smov 112   ;;  %v916_v15 = vmov 33   ;;  %s919_s28 = smov 72   ;;  %s1022_s0 = inlined_call_operand.vmem [shape: f32[32,512], index: 0, kind: input, shape index: {}]   ;;  %s1023_s1 = inlined_call_operand.vmem [shape: f32[8,128], index: 1, kind: input, shape index: {}]   ;;  %s1024_s2 = inlined_call_operand.vmem [shape: f32[1,512], index: 2, kind: output, shape index: {}]  }
   0x1   :  { %v12_v0 = vld [vmem:[%s1022_s0 + $0x8] sm:$0xff]  ;;  %v14_v2 = vld [vmem:[%s1022_s0 + $0x18] sm:$0xff]  ;;  %100 = vmatprep.mubr.f32.mxu0 %v913_v3  ;;  %171 = vmatprep.mubr.f32.mxu1 %v913_v3  ;;  %v11_v6 = vld [vmem:[%s1022_s0] sm:$0xff]  ;;  %vm188_vm1 = vcmask 64512   ;;  %v918_v30 = vmov 34   ;;  %s920_s29 = smov 80  }
   0x2   :  { %v16_v1 = vld [vmem:[%s1022_s0 + $0x28] sm:$0xff]  ;;  %v18_v5 = vld [vmem:[%s1022_s0 + $0x38] sm:$0xff]  ;;  %v15_v7 = vld [vmem:[%s1022_s0 + $0x20] sm:$0xff]  ;;  %893 = vset.pattern.permute.xlu0 %v914_v8  ;;  %894 = vset.pattern.permute.xlu1 %v916_v15  ;;  %v921_v58 = vmov 64  }
   0x3   :  { %v871_v4 = vpack.c.bf16 %v16_v1, %v12_v0  ;;  %v875_v9 = vpack.c.bf16 %v18_v5, %v14_v2  ;;  %v873_v10 = vpack.c.bf16 %v15_v7, %v11_v6  ;;  %v13_v11 = vld [vmem:[%s1022_s0 + $0x10] sm:$0xff]  ;;  %v967_v13 = vld [vmem:[%s1023_s1] sm:$0xff]  ;;  %s917_s1 = smov 104   ;;  %v20_v39 = vld [vmem:[%s1022_s0 + $0x48] sm:$0xff] }
   0x4   :  { %v17_v12 = vld [vmem:[%s1022_s0 + $0x30] sm:$0xff]  ;;  %30 = vperm.xlu0 %893, %v967_v13   ;;  %183 = vperm.xlu1 %894, %v967_v13   ;;  %v24_v40 = vld [vmem:[%s1022_s0 + $0x68] sm:$0xff]  ;;  %v22_v41 = vld [vmem:[%s1022_s0 + $0x58] sm:$0xff] }
   0x5   :  { %872 = vmatprep.subr.bf16.mxu0 %v871_v4  ;;  %v877_v14 = vpack.c.bf16 %v17_v12, %v13_v11  ;;  %876 = vmatprep.subr.bf16.mxu1 %v875_v9  ;;  %v26_v43 = vld [vmem:[%s1022_s0 + $0x78] sm:$0xff]  ;;  %v19_v44 = vld [vmem:[%s1022_s0 + $0x40] sm:$0xff]  ;;  %v21_v47 = vld [vmem:[%s1022_s0 + $0x50] sm:$0xff]  ;;  %v492_v52 = vmul.f32 %v24_v40, %v20_v39 }
   0x6   :  { %874 = vmatpush1.bf16.msra.mxu0 %v873_v10  ;;  %v23_v45 = vld [vmem:[%s1022_s0 + $0x60] sm:$0xff]  ;;  %v25_v48 = vld [vmem:[%s1022_s0 + $0x70] sm:$0xff]  ;;  %v494_v54 = vmul.f32 %v26_v43, %v22_v41 }
   0x7   :  { %878 = vmatpush1.bf16.msra.mxu1 %v877_v14  ;;  %v491_v55 = vmul.f32 %v23_v45, %v19_v44  ;;  %v493_v56 = vmul.f32 %v25_v48, %v21_v47 }
   0x8   :  { %186 = vrot.lane.b32.xlu0 %v967_v13, %s915_s27  ;;  %341 = vrot.lane.b32.xlu1 %v967_v13, %s917_s1 }
   0x9   :  { %857 = vmatmul.mubr.msk.f32.vlgmr.msra.gmra.mrb[0].mxu0 %vm33_vm0, %v967_v13  ;;  %895 = vset.pattern.permute.xlu0 %v918_v30  ;;  %v922_v30 = vmov 1966171168  }
   0xa   :  { %858 = vmatmul.mubr.msk.f32.vlgmr.msra.gmra.mrb[0].mxu1 %vm33_vm0, %v967_v13  ;;  %255 = vmatprep.mubr.f32.mxu0 %v913_v3 }
   0xb   :  { %326 = vmatprep.mubr.f32.mxu1 %v913_v3 }
   0xc   :  { %495 = vrot.lane.b32.xlu1 %v967_v13, %s919_s28  ;;  %338 = vperm.xlu0 %895, %v967_v13  }
  0x10   :  { %641 = vrot.lane.b32.xlu1 %v967_v13, %s920_s29  ;;  %896 = vset.pattern.permute.xlu0 %v921_v58 }
  0x11   :  { %788 = vperm.xlu0 %896, %v967_v13  }
  0x83   :  { %v31_v16 = vpop.permute.xlu0 %30  ;;  %v184_v31 = vpop.permute.xlu1 %183 }
  0x87   :  { %v187_v28 = vpop.permute.xlu0 %186  ;;  %v342_v51 = vpop.permute.xlu1 %341 }
  0x8b   :  { %v496_v57 = vpop.permute.xlu1 %495  ;;  %v339_v59 = vpop.permute.xlu0 %338 }
  0x8f   :  { %v642_v8 = vpop.permute.xlu1 %641 }
  0xdc   :  { %v102_v17 = vpop.f32.mrb[0].mxu0 }
  0xdd   :  { %v103_v18 = vadd.f32 %v102_v17, %v31_v16  ;;  %v173_v19 = vpop.f32.mrb[0].mxu1  ;;  %v104_v20 = vpop.f32.mrb[1].mxu0 }
  0xde   :  { %v174_v21 = vadd.f32 %v173_v19, %v31_v16  ;;  %v105_v22 = vadd.f32 %v104_v20, %v31_v16  ;;  %v175_v23 = vpop.f32.mrb[1].mxu1 }
  0xdf   :  { %v176_v24 = vadd.f32 %v175_v23, %v31_v16  ;;  %v178_v26 = vmax.f32 %v103_v18, 0.0 }
  0xe0   :  { %v179_v25 = vmax.f32 %v105_v22, 0.0  ;;  %v180_v29 = vmax.f32 %v174_v21, 0.0 }
  0xe1   :  { %v181_v27 = vmax.f32 %v176_v24, 0.0 }
  0xe2   :  { %191 = vmatprep.subr.mxu0 %v179_v25 }
  0xe3   :  { %262 = vmatprep.subr.mxu1 %v181_v27  ;;  %192 = vmatpush1.msra.mxu0 %v178_v26 }
  0xe4   :  { %263 = vmatpush1.msra.mxu1 %v180_v29  ;;  %859 = vmatmul.mubr.msk.f32.vlgmr.msra.gmra.mrb[2].mxu0 %vm188_vm1, %v187_v28 }
  0xe5   :  { %860 = vmatmul.mubr.msk.f32.vlgmr.msra.gmra.mrb[2].mxu1 %vm188_vm1, %v187_v28  ;;  %409 = vmatprep.mubr.f32.mxu0 %v913_v3 }
  0xe6   :  { %480 = vmatprep.mubr.f32.mxu1 %v913_v3 }
 0x1b7   :  { %v257_v32 = vpop.f32.mrb[2].mxu0 }
 0x1b8   :  { %v258_v33 = vadd.f32 %v257_v32, %v184_v31  ;;  %v328_v34 = vpop.f32.mrb[2].mxu1  ;;  %v259_v35 = vpop.f32.mrb[3].mxu0  ;;  %v828_v32 = vlaneseq }
 0x1b9   :  { %v329_v36 = vadd.f32 %v328_v34, %v184_v31  ;;  %v260_v37 = vadd.f32 %v259_v35, %v184_v31  ;;  %v330_v38 = vpop.f32.mrb[3].mxu1 }
 0x1ba   :  { %v331_v42 = vadd.f32 %v330_v38, %v184_v31  ;;  %v333_v49 = vmax.f32 %v258_v33, 0.0  ;;  %v826_v31 = vunpack.c.l.s4 %v922_v30  ;;  %v829_v34 = vshrl.u32 %v828_v32, 7 }
 0x1bb   :  { %v334_v46 = vmax.f32 %v260_v37, 0.0  ;;  %v335_v53 = vmax.f32 %v329_v36, 0.0  ;;  %vm850_vm2 = vcmp.lt.s32.totalorder %v828_v32, 512 }
 0x1bc   :  { %v336_v50 = vmax.f32 %v331_v42, 0.0  ;;  %v827_v33 = vunpack.c.0.s8 %v826_v31 }
 0x1bd   :  { %345 = vmatprep.subr.mxu0 %v334_v46 }
 0x1be   :  { %416 = vmatprep.subr.mxu1 %v336_v50  ;;  %346 = vmatpush1.msra.mxu0 %v333_v49  ;;  %v830_v37 = vsub.s32 %v827_v33, %v829_v34 }
 0x1bf   :  { %417 = vmatpush1.msra.mxu1 %v335_v53  ;;  %861 = vmatmul.mubr.msk.f32.vlgmr.msra.gmra.mrb[4].mxu0 %vm188_vm1, %v342_v51 }
 0x1c0   :  { %862 = vmatmul.mubr.msk.f32.vlgmr.msra.gmra.mrb[4].mxu1 %vm188_vm1, %v342_v51  ;;  %499 = vmatprep.subr.mxu0 %v492_v52 }
 0x1c1   :  { %570 = vmatprep.subr.mxu1 %v494_v54  ;;  %500 = vmatpush1.msra.mxu0 %v491_v55 }
 0x1c2   :  { %563 = vmatprep.mubr.f32.mxu0 %v913_v3  ;;  %571 = vmatpush1.msra.mxu1 %v493_v56 }
 0x1c3   :  { %634 = vmatprep.mubr.f32.mxu1 %v913_v3  ;;  %863 = vmatmul.mubr.msk.f32.vlgmr.msra.gmra.mrb[6].mxu0 %vm188_vm1, %v496_v57 }
 0x1c4   :  { %864 = vmatmul.mubr.msk.f32.vlgmr.msra.gmra.mrb[6].mxu1 %vm188_vm1, %v496_v57  ;;  %709 = vmatprep.mubr.f32.mxu0 %v913_v3 }
 0x1c5   :  { %780 = vmatprep.mubr.f32.mxu1 %v913_v3  ;;  %v789_v3 = vpop.permute.xlu0 %788 }
 0x292   :  { %v411_v60 = vpop.f32.mrb[4].mxu0 }
 0x293   :  { %v412_v61 = vadd.f32 %v411_v60, %v339_v59  ;;  %v482_v62 = vpop.f32.mrb[4].mxu1  ;;  %v413_v63 = vpop.f32.mrb[5].mxu0 }
 0x294   :  { %v483_v0 = vadd.f32 %v482_v62, %v339_v59  ;;  %v414_v1 = vadd.f32 %v413_v63, %v339_v59  ;;  %v484_v2 = vpop.f32.mrb[5].mxu1 }
 0x295   :  { %v485_v4 = vadd.f32 %v484_v2, %v339_v59  ;;  %v487_v6 = vmax.f32 %v412_v61, 0.0 }
 0x296   :  { %v488_v5 = vmax.f32 %v414_v1, 0.0  ;;  %v489_v9 = vmax.f32 %v483_v0, 0.0 }
 0x297   :  { %v490_v7 = vmax.f32 %v485_v4, 0.0 }
 0x298   :  { %645 = vmatprep.subr.mxu0 %v488_v5 }
 0x299   :  { %716 = vmatprep.subr.mxu1 %v490_v7  ;;  %646 = vmatpush1.msra.mxu0 %v487_v6 }
 0x29a   :  { %717 = vmatpush1.msra.mxu1 %v489_v9  ;;  %865 = vmatmul.mubr.msk.f32.vlgmr.msra.gmra.mrb[6].mxu0 %vm188_vm1, %v642_v8 }
 0x29b   :  { %866 = vmatmul.mubr.msk.f32.vlgmr.msra.gmra.mrb[6].mxu1 %vm188_vm1, %v642_v8 }
 0x36d   :  { %v711_v10 = vpop.f32.mrb[6].mxu0 }
 0x36e   :  { %v791_v11 = vadd.f32 %v789_v3, %v711_v10  ;;  %v782_v12 = vpop.f32.mrb[6].mxu1  ;;  %v713_v13 = vpop.f32.mrb[7].mxu0 }
 0x36f   :  { %v793_v14 = vadd.f32 %v789_v3, %v782_v12  ;;  %v792_v15 = vadd.f32 %v789_v3, %v713_v13  ;;  %v784_v16 = vpop.f32.mrb[7].mxu1 }
 0x370   :  { %v867_v17 = vmul.f32 -1.442695, %v791_v11  ;;  %v794_v18 = vadd.f32 %v789_v3, %v784_v16 }
 0x371   :  { %v869_v19 = vmul.f32 -1.442695, %v793_v14  ;;  %v868_v20 = vmul.f32 -1.442695, %v792_v15 }
 0x372   :  { %897 = vpow2.f32 %v867_v17  ;;  %v870_v21 = vmul.f32 -1.442695, %v794_v18 }
 0x373   :  { %899 = vpow2.f32 %v869_v19 }
 0x374   :  { %901 = vpow2.f32 %v868_v20 }
 0x375   :  { %903 = vpow2.f32 %v870_v21 }
 0x37c   :  { %v898_v22 = vpop.eup %897 }
 0x37d   :  { %v900_v23 = vpop.eup %899  ;;  %v807_v24 = vadd.f32 1.0, %v898_v22 }
 0x37e   :  { %v902_v25 = vpop.eup %901  ;;  %v809_v26 = vadd.f32 1.0, %v900_v23 }
 0x37f   :  { %v904_v27 = vpop.eup %903  ;;  %905 = vrcp.f32 %v807_v24  ;;  %v808_v28 = vadd.f32 1.0, %v902_v25 }
 0x380   :  { %907 = vrcp.f32 %v809_v26  ;;  %v810_v29 = vadd.f32 1.0, %v904_v27 }
 0x381   :  { %909 = vrcp.f32 %v808_v28 }
 0x382   :  { %911 = vrcp.f32 %v810_v29 }
 0x389   :  { %v906_v35 = vpop.eup %905 }
 0x38a   :  { %v908_v36 = vpop.eup %907 }
 0x38b   :  { %v910_v38 = vpop.eup %909 }
 0x38c   :  { %v912_v39 = vpop.eup %911  ;;  %v823_v40 = vcombine.low %v906_v35, %v910_v38 }
 0x38d   :  { %v824_v41 = vcombine.low %v908_v36, %v912_v39 }
 0x38e   :  { %v831_v42 = vrot.slane %v823_v40, %v830_v37 }
 0x38f   :  { %v838_v43 = vrot.slane %v824_v41, %v830_v37 }
 0x391   :  { %v839_v44 = vcombine.low %v831_v42, %v838_v43 }
 0x393   :  { %v846_v45 = vrot.slane %v839_v44, %v830_v37 }
 0x395   :  { %852 = vst.msk [vmem:[%s1024_s2] sm:$0xf] %vm850_vm2, %v846_v45 }

</bundles_post_ra>
